<compile_context>
chip_gen: v7x
topology: tpu7x:2x2x1
jax: 0.10.0
libtpu: 0.0.40
codegen_flags: <defaults>
</compile_context>

<pallas_src>
import functools

import jax
import jax.numpy as jnp
from jax.experimental import pallas as pl
from jax.experimental.pallas import tpu as pltpu

INPUT_DIM = 2
HIDDEN_DIM = 64
MAX_LEVERAGE = 1.0

TB_CAP = 16384                       # max batch-tile width (lanes); ~10-14 MiB VMEM at f32
VMEM_LIMIT_BYTES = 32 * 1024 * 1024  # <= scoped default on v6e/v7x, raises v5e's 16 MiB


def strategy_mlp_kernel(x_ref, w1t_ref, b1_ref, w2t_ref, b2_ref, w3_ref, b3_ref, o_ref):
    # Feature-major, lane-dense tiles (batch rides the 128-wide lane axis):
    #   x_ref  : (IN, TB)  f32        w1t_ref: (H, IN)  f32      b1_ref: (H, 1)  f32
    #   w2t_ref: (H2, H)   f32|bf16   b2_ref : (H2, 1)  f32
    #   w3_ref : (H2, 1)   f32        b3_ref : (1, 1)   f32
    #   o_ref  : (1, TB)   f32
    x = x_ref[...]                                                      # (IN, TB)

    # ---- Layer 1 (+bias+ReLU): K=2 matmul on the MXU (MXU has slack; frees the VALU). ----
    h1 = jnp.dot(w1t_ref[...], x, preferred_element_type=jnp.float32)   # (H, TB)
    h1 = jnp.maximum(h1 + b1_ref[...], 0.0)

    # ---- Layer 2 (+bias+ReLU): the one real matmul, (H2,H) x (H,TB) on the MXU. ----
    # Operands may be bf16 (v6e/v7x fast path); accumulation stays f32.
    w2t = w2t_ref[...]
    h2 = jnp.dot(w2t, h1.astype(w2t.dtype), preferred_element_type=jnp.float32)
    h2 = jnp.maximum(h2 + b2_ref[...], 0.0)                             # (H2, TB)

    # ---- Layer 3 (+bias+Tanh): N=1 output as VPU multiply + cross-sublane (XLU) reduce. ----
    z = jnp.sum(w3_ref[...] * h2, axis=0, keepdims=True) + b3_ref[...]  # (1, TB)
    o_ref[...] = (MAX_LEVERAGE * jnp.tanh(z)).astype(o_ref.dtype)


def _round_up(n, m):
    return ((n + m - 1) // m) * m


def _choose_tiling(batch):
    """Lane-dense batch tiling: TB multiple of 128 and <= TB_CAP, an even (>=2) number of
    grid steps (v7x megacore), and TB sized from B so the last tile is tightly padded."""
    b128 = _round_up(max(batch, 1), 128)
    n_tiles = max(2, -(-b128 // TB_CAP))     # >=2 steps so both v7x TensorCores get work
    n_tiles += n_tiles % 2                   # even step count -> balanced 2-core split
    tb = _round_up(-(-b128 // n_tiles), 128)
    return tb, tb * n_tiles, n_tiles


def _forward_feature_major(x_fm, params, use_bf16_mxu):
    """Core: x_fm (INPUT_DIM, B) feature-major -> (B, 1)."""
    w1, b1, w2, b2, w3, b3 = params          # PyTorch layout: w (in, out), b (1, out)
    B = x_fm.shape[1]

    # One-time layout plumbing (fused under jit); weights stay VMEM-resident across the grid.
    mxu_dtype = jnp.bfloat16 if use_bf16_mxu else jnp.float32
    w1_t = w1.T.astype(jnp.float32)          # (H, IN)  keep f32 -> preserves input precision
    w2_t = w2.T.astype(mxu_dtype)            # (H2, H)  the big MXU operand
    w3_c = w3.astype(jnp.float32)            # (H2, 1)
    b1_c = b1.reshape(-1, 1).astype(jnp.float32)   # (H, 1)
    b2_c = b2.reshape(-1, 1).astype(jnp.float32)   # (H2, 1)
    b3_c = b3.reshape(-1, 1).astype(jnp.float32)   # (1, 1)

    TB, B_pad, n_tiles = _choose_tiling(B)
    if B_pad != B:
        # Zero columns flow through ReLU/tanh to finite values and are sliced off below.
        x_fm = jnp.pad(x_fm, ((0, 0), (0, B_pad - B)))

    const_spec = lambda shape: pl.BlockSpec(shape, lambda i: (0, 0))  # resident weights

    out_fm = pl.pallas_call(
        strategy_mlp_kernel,
        out_shape=jax.ShapeDtypeStruct((1, B_pad), jnp.float32),
        grid=(n_tiles,),
        in_specs=[
            pl.BlockSpec((INPUT_DIM, TB), lambda i: (0, i)),   # lane-dense x tile
            const_spec(w1_t.shape),
            const_spec(b1_c.shape),
            const_spec(w2_t.shape),
            const_spec(b2_c.shape),
            const_spec(w3_c.shape),
            const_spec(b3_c.shape),
        ],
        out_specs=pl.BlockSpec((1, TB), lambda i: (0, i)),     # lane-dense output tile
        compiler_params=pltpu.CompilerParams(
            dimension_semantics=("parallel",),
            vmem_limit_bytes=VMEM_LIMIT_BYTES,
        ),
    )(x_fm, w1_t, b1_c, w2_t, b2_c, w3_c, b3_c)

    return out_fm[:, :B].reshape(B, 1)


@functools.partial(jax.jit, static_argnames=("use_bf16_mxu",))
def strategy_network_forward(x, params, use_bf16_mxu=False):
    """PyTorch-layout entry: x (B, INPUT_DIM) -> (B, 1). One fused transpose+pad."""
    return _forward_feature_major(x.T, params, use_bf16_mxu)


@functools.partial(jax.jit, static_argnames=("use_bf16_mxu",))
def strategy_network_forward_feature_major(x_fm, params, use_bf16_mxu=False):
    """Zero-relayout entry: x_fm (INPUT_DIM, B) feature-major -> (B, 1)."""
    return _forward_feature_major(x_fm, params, use_bf16_mxu)


def init_params(key, input_dim=INPUT_DIM, hidden_dim=HIDDEN_DIM):
    # Deterministic init mimicking PyTorch nn.Linear default: U(-1/sqrt(fan_in), 1/sqrt(fan_in)).
    h2 = hidden_dim // 2
    ks = jax.random.split(key, 6)

    def lin(kw, kb, fan_in, fan_out):
        bound = 1.0 / jnp.sqrt(fan_in)
        w = jax.random.uniform(kw, (fan_in, fan_out), jnp.float32, -bound, bound)
        b = jax.random.uniform(kb, (1, fan_out), jnp.float32, -bound, bound)
        return w, b

    w1, b1 = lin(ks[0], ks[1], input_dim, hidden_dim)
    w2, b2 = lin(ks[2], ks[3], hidden_dim, h2)
    w3, b3 = lin(ks[4], ks[5], h2, 1)
    return (w1, b1, w2, b2, w3, b3)


def reference_forward(x, params):
    w1, b1, w2, b2, w3, b3 = params
    h1 = jnp.maximum(x @ w1 + b1, 0.0)
    h2 = jnp.maximum(h1 @ w2 + b2, 0.0)
    return MAX_LEVERAGE * jnp.tanh(h2 @ w3 + b3)


if __name__ == "__main__":
    key = jax.random.PRNGKey(0)
    k_params, k_x, k_x2 = jax.random.split(key, 3)

    params = init_params(k_params)

    # pred_features: (batch, 2) = (direction, confidence)
    x = jax.random.normal(k_x, (8, INPUT_DIM), dtype=jnp.float32)
    out = jax.block_until_ready(strategy_network_forward(x, params))
    ref = reference_forward(x, params)
    assert out.shape == (8, 1)
    assert jnp.allclose(out, ref, atol=1e-4, rtol=1e-4)

    # Ragged batch (not a multiple of 128) exercises the tight-padding path.
    x2 = jax.random.normal(k_x2, (200, INPUT_DIM), dtype=jnp.float32)
    out2 = jax.block_until_ready(strategy_network_forward(x2, params))
    ref2 = reference_forward(x2, params)
    assert out2.shape == (200, 1)
    assert jnp.allclose(out2, ref2, atol=1e-4, rtol=1e-4)

    # Feature-major entry point: no wrapper transpose/copy at all.
    out_fm = jax.block_until_ready(
        strategy_network_forward_feature_major(x2.T, params))
    assert out_fm.shape == (200, 1)
    assert jnp.allclose(out_fm, ref2, atol=1e-4, rtol=1e-4)

    # bf16 MXU-operand fast path (v6e/v7x); accumulation, layer 3 and tanh stay f32.
    out_bf16 = jax.block_until_ready(
        strategy_network_forward(x2, params, use_bf16_mxu=True))
    assert out_bf16.shape == (200, 1)
    assert jnp.allclose(out_bf16, ref2, atol=5e-2, rtol=5e-2)

    print("KERNEL_OK")
</pallas_src>

<mosaic_0001>
module attributes {stable_mosaic.version = 11 : i64} {
  func.func @strategy_mlp_kernel(%arg0: i32, %arg1: memref<2x128xf32, #tpu.memory_space<vmem>>, %arg2: memref<64x2xf32, #tpu.memory_space<vmem>>, %arg3: memref<64x1xf32, #tpu.memory_space<vmem>>, %arg4: memref<32x64xf32, #tpu.memory_space<vmem>>, %arg5: memref<32x1xf32, #tpu.memory_space<vmem>>, %arg6: memref<32x1xf32, #tpu.memory_space<vmem>>, %arg7: memref<1x1xf32, #tpu.memory_space<vmem>>, %arg8: memref<1x128xf32, #tpu.memory_space<vmem>>) attributes {dimension_semantics = [#tpu.dimension_semantics<parallel>], iteration_bounds = array<i64: 2>, scalar_prefetch = 0 : i64, scratch_operands = 0 : i64, tpu.core_type = #tpu.core_type<tc>, window_params = [{transform_indices = @transform_0, window_bounds = array<i64: 2, 128>}, {pipeline_mode = #tpu.pipeline_mode<synchronous>, transform_indices = @transform_1, window_bounds = array<i64: 64, 2>}, {pipeline_mode = #tpu.pipeline_mode<synchronous>, transform_indices = @transform_2, window_bounds = array<i64: 64, 1>}, {pipeline_mode = #tpu.pipeline_mode<synchronous>, transform_indices = @transform_3, window_bounds = array<i64: 32, 64>}, {pipeline_mode = #tpu.pipeline_mode<synchronous>, transform_indices = @transform_4, window_bounds = array<i64: 32, 1>}, {pipeline_mode = #tpu.pipeline_mode<synchronous>, transform_indices = @transform_5, window_bounds = array<i64: 32, 1>}, {pipeline_mode = #tpu.pipeline_mode<synchronous>, transform_indices = @transform_6, window_bounds = array<i64: 1, 1>}, {transform_indices = @transform_7, window_bounds = array<i64: 1, 128>}]} {
    %c0 = arith.constant 0 : index
    %c0_0 = arith.constant 0 : index
    %0 = vector.load %arg1[%c0, %c0_0] : memref<2x128xf32, #tpu.memory_space<vmem>>, vector<2x128xf32>
    %c0_1 = arith.constant 0 : index
    %c0_2 = arith.constant 0 : index
    %1 = vector.load %arg2[%c0_1, %c0_2] : memref<64x2xf32, #tpu.memory_space<vmem>>, vector<64x2xf32>
    %cst = arith.constant dense<0.000000e+00> : vector<64x128xf32>
    %2 = tpu.matmul %1, %0, %cst {dimension_numbers = #tpu.dot_dimension_numbers<[1], [0], [0], [1], [0, 0, 1, 1], [], []>} : vector<64x2xf32>, vector<2x128xf32>, vector<64x128xf32> -> vector<64x128xf32>
    %c0_3 = arith.constant 0 : index
    %c0_4 = arith.constant 0 : index
    %3 = vector.load %arg3[%c0_3, %c0_4] : memref<64x1xf32, #tpu.memory_space<vmem>>, vector<64x1xf32>
    %4 = vector.broadcast %3 : vector<64x1xf32> to vector<64x128xf32>
    %5 = arith.addf %2, %4 : vector<64x128xf32>
    %cst_5 = arith.constant 0.000000e+00 : f32
    %6 = vector.broadcast %cst_5 : f32 to vector<64x128xf32>
    %7 = arith.maximumf %5, %6 : vector<64x128xf32>
    %c0_6 = arith.constant 0 : index
    %c0_7 = arith.constant 0 : index
    %8 = vector.load %arg4[%c0_6, %c0_7] : memref<32x64xf32, #tpu.memory_space<vmem>>, vector<32x64xf32>
    %cst_8 = arith.constant dense<0.000000e+00> : vector<32x128xf32>
    %9 = tpu.matmul %8, %7, %cst_8 {dimension_numbers = #tpu.dot_dimension_numbers<[1], [0], [0], [1], [0, 0, 1, 1], [], []>} : vector<32x64xf32>, vector<64x128xf32>, vector<32x128xf32> -> vector<32x128xf32>
    %c0_9 = arith.constant 0 : index
    %c0_10 = arith.constant 0 : index
    %10 = vector.load %arg5[%c0_9, %c0_10] : memref<32x1xf32, #tpu.memory_space<vmem>>, vector<32x1xf32>
    %11 = vector.broadcast %10 : vector<32x1xf32> to vector<32x128xf32>
    %12 = arith.addf %9, %11 : vector<32x128xf32>
    %cst_11 = arith.constant 0.000000e+00 : f32
    %13 = vector.broadcast %cst_11 : f32 to vector<32x128xf32>
    %14 = arith.maximumf %12, %13 : vector<32x128xf32>
    %c0_12 = arith.constant 0 : index
    %c0_13 = arith.constant 0 : index
    %15 = vector.load %arg6[%c0_12, %c0_13] : memref<32x1xf32, #tpu.memory_space<vmem>>, vector<32x1xf32>
    %16 = vector.broadcast %15 : vector<32x1xf32> to vector<32x128xf32>
    %17 = arith.mulf %16, %14 : vector<32x128xf32>
    %cst_14 = arith.constant dense<0.000000e+00> : vector<128xf32>
    %18 = vector.multi_reduction <add>, %17, %cst_14 [0] : vector<32x128xf32> to vector<128xf32>
    %19 = vector.shape_cast %18 : vector<128xf32> to vector<1x128xf32>
    %c0_15 = arith.constant 0 : index
    %c0_16 = arith.constant 0 : index
    %20 = vector.load %arg7[%c0_15, %c0_16] : memref<1x1xf32, #tpu.memory_space<vmem>>, vector<1x1xf32>
    %21 = vector.broadcast %20 : vector<1x1xf32> to vector<1x128xf32>
    %22 = arith.addf %19, %21 : vector<1x128xf32>
    %23 = math.tanh %22 : vector<1x128xf32>
    %cst_17 = arith.constant 1.000000e+00 : f32
    %24 = vector.broadcast %cst_17 : f32 to vector<1x128xf32>
    %25 = arith.mulf %24, %23 : vector<1x128xf32>
    %c0_18 = arith.constant 0 : index
    %c0_19 = arith.constant 0 : index
    %26 = vector.load %arg8[%c0_18, %c0_19] : memref<1x128xf32, #tpu.memory_space<vmem>>, vector<1x128xf32>
    tpu.vector_store %arg8[%c0_18, %c0_19], %25 {strides = array<i32>} : memref<1x128xf32, #tpu.memory_space<vmem>>, vector<1x128xf32>,
    return
  }
  func.func @transform_0(%arg0: i32) -> (i32, i32) {
    %c0_i32 = arith.constant 0 : i32
    %c0_i32_0 = arith.constant 0 : i32
    return %c0_i32, %arg0 : i32, i32
  }
  func.func @transform_1(%arg0: i32) -> (i32, i32) {
    %c0_i32 = arith.constant 0 : i32
    %c0_i32_0 = arith.constant 0 : i32
    %c0_i32_1 = arith.constant 0 : i32
    return %c0_i32, %c0_i32_0 : i32, i32
  }
  func.func @transform_2(%arg0: i32) -> (i32, i32) {
    %c0_i32 = arith.constant 0 : i32
    %c0_i32_0 = arith.constant 0 : i32
    %c0_i32_1 = arith.constant 0 : i32
    return %c0_i32, %c0_i32_0 : i32, i32
  }
  func.func @transform_3(%arg0: i32) -> (i32, i32) {
    %c0_i32 = arith.constant 0 : i32
    %c0_i32_0 = arith.constant 0 : i32
    %c0_i32_1 = arith.constant 0 : i32
    return %c0_i32, %c0_i32_0 : i32, i32
  }
  func.func @transform_4(%arg0: i32) -> (i32, i32) {
    %c0_i32 = arith.constant 0 : i32
    %c0_i32_0 = arith.constant 0 : i32
    %c0_i32_1 = arith.constant 0 : i32
    return %c0_i32, %c0_i32_0 : i32, i32
  }
  func.func @transform_5(%arg0: i32) -> (i32, i32) {
    %c0_i32 = arith.constant 0 : i32
    %c0_i32_0 = arith.constant 0 : i32
    %c0_i32_1 = arith.constant 0 : i32
    return %c0_i32, %c0_i32_0 : i32, i32
  }
  func.func @transform_6(%arg0: i32) -> (i32, i32) {
    %c0_i32 = arith.constant 0 : i32
    %c0_i32_0 = arith.constant 0 : i32
    %c0_i32_1 = arith.constant 0 : i32
    return %c0_i32, %c0_i32_0 : i32, i32
  }
  func.func @transform_7(%arg0: i32) -> (i32, i32) {
    %c0_i32 = arith.constant 0 : i32
    %c0_i32_0 = arith.constant 0 : i32
    return %c0_i32, %arg0 : i32, i32
  }
}

</mosaic_0001>

<bundles_post_ra>
// kernel: strategy_network_forward.1
= control target key start
LH: loop header
LB: loop body
LE: loop exit
PB: predicated region body
PF: predicated region fallthrough
CT: control target
= control target key end

     0   :  { %s867_s26 = smov 0   ;;  %s984_s0 = inlined_call_operand.vmem [shape: f32[2,256], index: 0, kind: input, shape index: {}]   ;;  %s985_s1 = inlined_call_operand.vmem [shape: f32[64,2], index: 1, kind: input, shape index: {}]   ;;  %s986_s2 = inlined_call_operand.vmem [shape: f32[64,1], index: 2, kind: input, shape index: {}]   ;;  %s987_s3 = inlined_call_operand.vmem [shape: f32[32,64], index: 3, kind: input, shape index: {}]   ;;  %s988_s4 = inlined_call_operand.vmem [shape: f32[32,1], index: 4, kind: input, shape index: {}]   ;;  %s989_s5 = inlined_call_operand.vmem [shape: f32[32,1], index: 5, kind: input, shape index: {}]   ;;  %s990_s6 = inlined_call_operand.<no memory space> [shape: f32[1,1], index: 6, kind: input, shape index: {}]   ;;  %s991_s7 = inlined_call_operand.vmem [shape: f32[1,256], index: 7, kind: output, shape index: {}]  }
   0x1   :  { %v12_v0 = vstv %s990_s6 }
   0x2   :  { %13 = vst [vmem:[#allocation2] sm:$0x1] %v12_v0 }
   0x3 LB: > { %s700_s27 = sadd.s32 4294967295, %s821_s26   ;;  %p704_p0 = scmp.ge.s32.totalorder %s821_s26, 1  ;;  %s821_s26 = sphi %s867_s26, %s19_s26  }
   0x4   : > { %p238_p1 = scmp.lt.s32.totalorder %s821_s26, 3 }
   0x6   : > { %p239_p2 = pnand %p704_p0, %p238_p1 }
   0x7   : > { %p267_p3 = scmp.lt.s32.totalorder (!%p239_p2), %s700_s27, 1  ;;  %v275_v1 = vld [vmem:[%s985_s1] sm:$0xff] (!%p239_p2)  ;;  %vm331_vm0 = vcmask (!%p239_p2), 15360   ;;  %v823_v2 = vmov (!%p239_p2), 0   ;;  %v285_v4 = vld [vmem:[%s986_s2 + $0x10] sm:$0xff] (!%p239_p2)  ;;  %vm356_vm1 = vcmask (!%p239_p2), 1041408  }
   0x8   : > { %242 = sbr.rel (%p239_p2) target bundleno = 507 (0x1fb), region = 48  ;;  %744 = vmatprep.mubr.msk.f32.mxu0 (!%p239_p2), %vm331_vm0, %v275_v1  ;;  %811 = vset.pattern.permute.xlu0 (!%p239_p2), %v823_v2  ;;  %v283_v3 = vld [vmem:[%s986_s2] sm:$0xff] (!%p239_p2)  ;;  %v284_v5 = vld [vmem:[%s986_s2 + $0x8] sm:$0xff] (!%p239_p2)  ;;  %v286_v6 = vld [vmem:[%s986_s2 + $0x18] sm:$0xff] (!%p239_p2)  ;;  %vm501_vm2 = vcmask (!%p239_p2), 523264  }
   0x9   : > { %812 = vset.pattern.permute.xlu1 (!%p239_p2), %v823_v2  ;;  %293 = vperm.xlu0 (!%p239_p2), %811, %v283_v3   ;;  %v276_v8 = vld [vmem:[%s985_s1 + $0x8] sm:$0xff] (!%p239_p2)  ;;  %v277_v9 = vld [vmem:[%s985_s1 + $0x10] sm:$0xff] (!%p239_p2)  ;;  %v287_v10 = vld [vmem:[%s986_s2 + $0x20] sm:$0xff] (!%p239_p2) }
   0xa   : > { %303 = vperm.xlu1 (!%p239_p2), %812, %v285_v4   ;;  %v288_v11 = vld [vmem:[%s986_s2 + $0x28] sm:$0xff] (!%p239_p2)  ;;  %v278_v12 = vld [vmem:[%s985_s1 + $0x18] sm:$0xff] (!%p239_p2)  ;;  %v279_v13 = vld [vmem:[%s985_s1 + $0x20] sm:$0xff] (!%p239_p2) }
   0xb   : > { %v289_v14 = vld [vmem:[%s986_s2 + $0x30] sm:$0xff] (!%p239_p2)  ;;  %v290_v15 = vld [vmem:[%s986_s2 + $0x38] sm:$0xff] (!%p239_p2)  ;;  %v280_v16 = vld [vmem:[%s985_s1 + $0x28] sm:$0xff] (!%p239_p2) }
   0xc   : > { %v281_v17 = vld [vmem:[%s985_s1 + $0x30] sm:$0xff] (!%p239_p2)  ;;  %v477_v18 = vld [vmem:[%s988_s4] sm:$0xff] (!%p239_p2)  ;;  %v478_v19 = vld [vmem:[%s988_s4 + $0x8] sm:$0xff] (!%p239_p2) }
   0xd   : > { %298 = vperm.xlu0 (!%p239_p2), %811, %v284_v5   ;;  %v282_v20 = vld [vmem:[%s985_s1 + $0x38] sm:$0xff] (!%p239_p2)  ;;  %v479_v21 = vld [vmem:[%s988_s4 + $0x10] sm:$0xff] (!%p239_p2)  ;;  %v603_v23 = vld [vmem:[%s989_s5] sm:$0xff] (!%p239_p2) }
   0xe   : > { %308 = vperm.xlu1 (!%p239_p2), %812, %v286_v6   ;;  %v480_v22 = vld [vmem:[%s988_s4 + $0x18] sm:$0xff] (!%p239_p2)  ;;  %v604_v24 = vld [vmem:[%s989_s5 + $0x8] sm:$0xff] (!%p239_p2)  ;;  %v605_v25 = vld [vmem:[%s989_s5 + $0x10] sm:$0xff] (!%p239_p2) }
   0xf   : > { %s993_s27 = smov (!%p267_p3, %s700_s27), 1  ;;  %v606_v26 = vld [vmem:[%s989_s5 + $0x18] sm:$0xff]  ;;  %v640_v27 = vld [vmem:[#allocation2] sm:$0x1]  ;;  %v475_v29 = vld [vmem:[%s987_s3 + $0x10] sm:$0xff] }
  0x10   : > { %s705_s10 = sshll.u32 %s993_s27, 1  ;;  %v473_v28 = vld [vmem:[%s987_s3] sm:$0xff]  ;;  %775 = vmatprep.mubr.msk.f32.mxu1 %vm501_vm2, %v475_v29  ;;  %v474_v2 = vld [vmem:[%s987_s3 + $0x8] sm:$0xff]  ;;  %v476_v3 = vld [vmem:[%s987_s3 + $0x18] sm:$0xff]  ;;  %s273_s22 = scalar_lea.vmem %s991_s7, %s993_s27 }
  0x11   : > { %s270_s15 = scalar_lea.vmem %s984_s0, %s705_s10  ;;  %313 = vperm.xlu0 %811, %v287_v10  }
  0x12   : > { %v274_v7 = vld [vmem:[%s270_s15] sm:$0x3]  ;;  %318 = vperm.xlu1 %812, %v288_v11  }
  0x13   : > { %742 = vmatprep.subr.msk.mxu0 %vm356_vm1, %v274_v7 }
  0x14   : > { %743 = vmatpush3.msk.msra.mxu0 %vm356_vm1, %v274_v7 }
  0x15   : > { %745 = vmatmul.mubr.msk.f32.vlgmr.msra.gmra.mrb[0].mxu0 %vm331_vm0, %v276_v8  ;;  %323 = vperm.xlu0 %811, %v289_v14  }
  0x16   : > { %747 = vmatprep.mubr.msk.f32.mxu0 %vm331_vm0, %v277_v9  ;;  %328 = vperm.xlu1 %812, %v290_v15  }
  0x19   : > { %748 = vmatmul.mubr.msk.f32.gmra.mrb[2].mxu0 %vm331_vm0, %v278_v12  ;;  %483 = vperm.xlu0 %811, %v477_v18  }
  0x1a   : > { %750 = vmatprep.mubr.msk.f32.mxu0 %vm331_vm0, %v279_v13  ;;  %488 = vperm.xlu1 %812, %v478_v19  }
  0x1d   : > { %751 = vmatmul.mubr.msk.f32.gmra.mrb[4].mxu0 %vm331_vm0, %v280_v16  ;;  %493 = vperm.xlu0 %811, %v479_v21  }
  0x1e   : > { %753 = vmatprep.mubr.msk.f32.mxu0 %vm331_vm0, %v281_v17  ;;  %498 = vperm.xlu1 %812, %v480_v22  }
  0x21   : > { %754 = vmatmul.mubr.msk.f32.gmra.mrb[6].mxu0 %vm331_vm0, %v282_v20  ;;  %609 = vperm.xlu0 %811, %v603_v23  }
  0x22   : > { %614 = vperm.xlu1 %812, %v604_v24   ;;  %772 = vmatprep.mubr.msk.f32.mxu0 %vm501_vm2, %v473_v28 }
  0x25   : > { %619 = vperm.xlu0 %811, %v605_v25  }
  0x26   : > { %624 = vperm.xlu1 %812, %v606_v26  }
  0x29   : > { %643 = vperm.xlu0 %811, %v640_v27  }
  0x88   : > { %v294_v30 = vpop.permute.xlu0 %293 }
  0x89   : > { %v304_v31 = vpop.permute.xlu1 %303 }
  0x8c   : > { %v299_v32 = vpop.permute.xlu0 %298 }
  0x8d   : > { %v309_v33 = vpop.permute.xlu1 %308 }
  0x90   : > { %v314_v46 = vpop.permute.xlu0 %313 }
  0x91   : > { %v319_v43 = vpop.permute.xlu1 %318 }
  0x94   : > { %v324_v58 = vpop.permute.xlu0 %323 }
  0x95   : > { %v329_v55 = vpop.permute.xlu1 %328 }
  0x98   : > { %v484_v4 = vpop.permute.xlu0 %483 }
  0x99   : > { %v489_v5 = vpop.permute.xlu1 %488 }
  0x9c   : > { %v494_v6 = vpop.permute.xlu0 %493 }
  0x9d   : > { %v499_v7 = vpop.permute.xlu1 %498 }
  0xa0   : > { %v610_v8 = vpop.permute.xlu0 %609 }
  0xa1   : > { %v615_v17 = vpop.permute.xlu1 %614 }
  0xa4   : > { %v620_v24 = vpop.permute.xlu0 %619 }
  0xa5   : > { %v625_v27 = vpop.permute.xlu1 %624 }
  0xe8   : > { %v746_v34 = vpop.f32.mrb[0].mxu0 }
  0xe9   : > { %v432_v35 = vadd.f32 %v746_v34, %v299_v32  ;;  %v426_v36 = vpop.f32.mrb[1].mxu0 }
  0xea   : > { %v427_v37 = vadd.f32 %v426_v36, %v294_v30  ;;  %v646_v30 = vlaneseq }
  0xeb   : > { %v466_v38 = vmax.f32 %v432_v35, 0.0 }
  0xec   : > { %v465_v39 = vmax.f32 %v427_v37, 0.0  ;;  %v749_v40 = vpop.f32.mrb[2].mxu0 }
  0xed   : > { %v442_v41 = vadd.f32 %v749_v40, %v309_v33  ;;  %v436_v42 = vpop.f32.mrb[3].mxu0  ;;  %v647_v33 = vshrl.u32 %v646_v30, 7 }
  0xee   : > { %v778_v44 = vpack.c.bf16 %v466_v38, %v465_v39  ;;  %v437_v45 = vadd.f32 %v436_v42, %v304_v31  ;;  %v644_v38 = vpop.permute.xlu0 %643 }
  0xef   : > { %v468_v47 = vmax.f32 %v442_v41, 0.0  ;;  %v648_v36 = vsub.s32 0, %v647_v33 }
  0xf0   : > { %v467_v48 = vmax.f32 %v437_v45, 0.0  ;;  %v752_v49 = vpop.f32.mrb[4].mxu0  ;;  %779 = vmatprep.subr.bf16.mxu0 %v778_v44  ;;  %794 = vmatprep.subr.bf16.mxu1 %v778_v44 }
  0xf1   : > { %v452_v50 = vadd.f32 %v752_v49, %v319_v43  ;;  %v446_v51 = vpop.f32.mrb[5].mxu0  ;;  %781 = vmatpush3.bf16.msra.mxu0 %v778_v44  ;;  %798 = vmatpush3.bf16.msra.mxu1 %v778_v44  ;;  %v649_v40 = vrot.slane %v644_v38, %v648_v36 }
  0xf2   : > { %v782_v52 = vpack.c.bf16 %v468_v47, %v467_v48  ;;  %v447_v53 = vadd.f32 %v446_v51, %v314_v46 }
  0xf3   : > { %v470_v54 = vmax.f32 %v452_v50, 0.0 }
  0xf4   : > { %v469_v56 = vmax.f32 %v447_v53, 0.0  ;;  %v755_v57 = vpop.f32.mrb[6].mxu0  ;;  %783 = vmatprep.subr.bf16.mxu0 %v782_v52  ;;  %795 = vmatprep.subr.bf16.mxu1 %v782_v52 }
  0xf5   : > { %v462_v59 = vadd.f32 %v755_v57, %v329_v55  ;;  %v456_v60 = vpop.f32.mrb[7].mxu0  ;;  %785 = vmatpush3.bf16.msra.mxu0 %v782_v52  ;;  %799 = vmatpush3.bf16.msra.mxu1 %v782_v52 }
  0xf6   : > { %v786_v61 = vpack.c.bf16 %v470_v54, %v469_v56  ;;  %v457_v62 = vadd.f32 %v456_v60, %v324_v58 }
  0xf7   : > { %v472_v63 = vmax.f32 %v462_v59, 0.0 }
  0xf8   : > { %v471_v0 = vmax.f32 %v457_v62, 0.0  ;;  %787 = vmatprep.subr.bf16.mxu0 %v786_v61  ;;  %796 = vmatprep.subr.bf16.mxu1 %v786_v61 }
  0xf9   : > { %789 = vmatpush3.bf16.msra.mxu0 %v786_v61  ;;  %800 = vmatpush3.bf16.msra.mxu1 %v786_v61 }
  0xfa   : > { %v790_v1 = vpack.c.bf16 %v472_v63, %v471_v0 }
  0xfc   : > { %791 = vmatprep.subr.bf16.mxu0 %v790_v1  ;;  %797 = vmatprep.subr.bf16.mxu1 %v790_v1 }
  0xfd   : > { %793 = vmatpush3.bf16.msra.mxu0 %v790_v1  ;;  %801 = vmatpush3.bf16.msra.mxu1 %v790_v1 }
 0x100   : > { %773 = vmatmul.mubr.msk.f32.vlgmr.msra.gmra.mrb[8].mxu0 %vm501_vm2, %v474_v2  ;;  %776 = vmatmul.mubr.msk.f32.vlgmr.msra.gmra.mrb[0].mxu1 %vm501_vm2, %v476_v3 }
 0x1d3   : > { %v774_v9 = vpop.f32.mrb[8].mxu0  ;;  %v777_v10 = vpop.f32.mrb[0].mxu1 }
 0x1d4   : > { %v586_v11 = vadd.f32 %v774_v9, %v489_v5  ;;  %v580_v12 = vpop.f32.mrb[9].mxu0  ;;  %v590_v13 = vpop.f32.mrb[1].mxu1  ;;  %v596_v14 = vadd.f32 %v777_v10, %v499_v7 }
 0x1d5   : > { %v581_v15 = vadd.f32 %v580_v12, %v484_v4  ;;  %v591_v16 = vadd.f32 %v590_v13, %v494_v6 }
 0x1d6   : > { %v600_v18 = vmax.f32 %v586_v11, 0.0  ;;  %v602_v22 = vmax.f32 %v596_v14, 0.0 }
 0x1d7   : > { %v599_v19 = vmax.f32 %v581_v15, 0.0  ;;  %v601_v20 = vmax.f32 %v591_v16, 0.0 }
 0x1d8   : > { %v628_v21 = vmul.f32 %v615_v17, %v600_v18  ;;  %v630_v28 = vmul.f32 %v625_v27, %v602_v22 }
 0x1d9   : > { %v627_v23 = vmul.f32 %v610_v8, %v599_v19  ;;  %v629_v26 = vmul.f32 %v620_v24, %v601_v20 }
 0x1db   : > { %v631_v25 = vadd.f32 %v628_v21, %v627_v23 }
 0x1dd   : > { %v632_v29 = vadd.f32 %v631_v25, %v629_v26 }
 0x1df   : > { %v633_v31 = vadd.f32 %v632_v29, %v630_v28 }
 0x1e1   : > { %v634_v32 = vrot.slane %v633_v31, 4 }
 0x1e3   : > { %v635_v34 = vadd.f32 %v634_v32, %v633_v31 }
 0x1e5   : > { %v636_v35 = vrot.slane %v635_v34, 2 }
 0x1e7   : > { %v637_v37 = vadd.f32 %v636_v35, %v635_v34 }
 0x1e9   : > { %v638_v39 = vrot.slane %v637_v37, 1 }
 0x1eb   : > { %v639_v41 = vadd.f32 %v638_v39, %v637_v37 }
 0x1ed   : > { %v650_v42 = vadd.f32 %v649_v40, %v639_v41 }
 0x1ef   : > { %813 = vtanh.f32 %v650_v42 }
 0x1f9   : > { %v814_v43 = vpop.eup %813 }
 0x1fa   : > { %652 = vst [vmem:[%s273_s22] sm:$0x1] %v814_v43 }
 0x1fb PF: > { %s19_s26 = sadd.s32 1, %s821_s26  }
 0x1fc   : > { %p16_p4 = scmp.ge.s32.totalorder %s19_s26, 4  }
 0x1fe   :  { %18 = sbr.rel (!%p16_p4) target bundleno = 3 (0x3), region = 78 }

</bundles_post_ra>
